<compile_context>
chip_gen: v7x
topology: tpu7x:2x2x1
jax: 0.10.0
libtpu: 0.0.40
codegen_flags: <defaults>
</compile_context>

<pallas_src>
import jax
import jax.numpy as jnp
from jax import lax
from jax.experimental import pallas as pl
from jax.experimental.pallas import tpu as pltpu


def single_layer_kernel(x_ref, bn_ref, m_ref, out_ref):
    # x_ref  : (B, H, W*C)   f32  -- B images, lane = w*C + c
    # bn_ref : (2, W*C)      f32  -- row 0 = BN scale, row 1 = BN shift (per lane)
    # m_ref  : (K_pad, W*G)  bf16 -- fused block-Toeplitz conv matrix (all 9 taps)
    # out_ref: (B, H, W*G)   f32  -- conv output rows, lane = w*G + g
    B, H, WC = x_ref.shape
    M = B * H
    K = m_ref.shape[0]
    WG = out_ref.shape[2]

    bn = bn_ref[...]
    scale = bn[0:1, :]                                  # (1, W*C)
    shift = bn[1:2, :]

    # BN affine + ReLU (stats were computed in the wrapper).  Pure VPU pass.
    # (W*C may be a half vreg at tiny C; pack two rows per vreg if VPU-bound.)
    x = x_ref[...].reshape(M, WC)                       # free reshape (leading dims)
    a = jnp.maximum(x * scale + shift, 0.0)             # (M, W*C) f32

    # Neighbour rows via sublane rolls (XLU) + boundary masks: zero padding along H
    # and no leakage between the B stacked images.
    r = lax.broadcasted_iota(jnp.int32, (M, 1), 0)
    h = r % H
    a_up = jnp.where(h == 0, 0.0, pltpu.roll(a, 1, 0))          # row h-1
    a_dn = jnp.where(h == H - 1, 0.0, pltpu.roll(a, M - 1, 0))  # row h+1

    pieces = [a_up, a, a_dn]
    if K > 3 * WC:                                      # pad contraction to K_pad
        pieces.append(jnp.zeros((M, K - 3 * WC), jnp.float32))
    lhs = jnp.concatenate(pieces, axis=-1).astype(jnp.bfloat16)  # (M, K_pad)

    # Single fused MXU matmul: all 3 dh taps contracted at once, f32 accumulator.
    out = jnp.dot(lhs, m_ref[...], preferred_element_type=jnp.float32)
    out_ref[...] = out.reshape(B, H, WG).astype(out_ref.dtype)


def _band_matrices(w_oihw, Wdim):
    """Per-dh block-Toeplitz matrices M[dh] of shape (W*C, W*G) such that
    (row @ M[dh])[w*G + g] = sum_{dw,c} row[(w+dw-1)*C + c] * weight[g, c, dh, dw]
    with out-of-range W positions dropped (== zero padding along W)."""
    G, C, _, _ = w_oihw.shape
    wt = jnp.transpose(w_oihw, (2, 3, 1, 0)).astype(jnp.float32)   # (3, 3, C, G)
    eye = jnp.eye(Wdim + 2, dtype=jnp.float32)
    mats = []
    for dh in range(3):
        M = jnp.zeros(((Wdim + 2) * C, Wdim * G), jnp.float32)
        for dw in range(3):
            S = eye[:, dw:dw + Wdim]                 # (W+2, W): S[w+dw, w] = 1
            M = M + jnp.kron(S, wt[dh, dw])          # rows in padded-W coordinates
        mats.append(M[C:(Wdim + 1) * C, :])          # drop pad rows -> (W*C, W*G)
    return jnp.stack(mats, axis=0)                   # (3, W*C, W*G)


def single_layer_forward(x_nchw, gamma, beta, w_oihw, eps=1e-5):
    """x_nchw: (N, C, H, W); w_oihw: (G, C, 3, 3). Returns (N, C+G, H, W)."""
    N, C, H, W = x_nchw.shape
    G = w_oihw.shape[0]
    x_nchw = x_nchw.astype(jnp.float32)

    # Training-mode BatchNorm batch stats, ONE pass over x in its native layout
    # (biased variance = E[x^2] - E[x]^2; guarded against tiny negative values).
    cnt = float(N * H * W)
    s1 = jnp.sum(x_nchw, axis=(0, 2, 3))
    s2 = jnp.sum(jnp.square(x_nchw), axis=(0, 2, 3))
    mean = s1 / cnt
    var = jnp.maximum(s2 / cnt - mean * mean, 0.0)
    scale_c = gamma.astype(jnp.float32) * lax.rsqrt(var + eps)
    shift_c = beta.astype(jnp.float32) - mean * scale_c
    bn = jnp.stack([jnp.tile(scale_c, W), jnp.tile(shift_c, W)], axis=0)  # (2, W*C)

    # Row layout for the kernel (contiguous reshape of NHWC).
    x_nhwc = jnp.transpose(x_nchw, (0, 2, 3, 1))           # (N, H, W, C)
    x_rows = x_nhwc.reshape(N, H, W * C)

    # Fused (3*W*C, W*G) band matrix, zero-padded along K to a multiple of 128,
    # cast to bf16 for the MXU (also halves its VMEM footprint on v7x).
    kc = 3 * W * C
    k_pad = ((kc + 127) // 128) * 128
    m_fused = _band_matrices(w_oihw, W).reshape(kc, W * G)
    if k_pad > kc:
        m_fused = jnp.concatenate(
            [m_fused, jnp.zeros((k_pad - kc, W * G), jnp.float32)], axis=0)
    m_fused = m_fused.astype(jnp.bfloat16)                 # (K_pad, W*G)

    # Batch blocking: two "parallel" grid steps (keeps both v7x TCs busy) of
    # N//2 images each; v5e/v6e pipeline the two steps.  Odd N -> one image/step.
    grid_n = 2 if (N >= 2 and N % 2 == 0) else N
    b_blk = N // grid_n

    conv_rows = pl.pallas_call(
        single_layer_kernel,
        out_shape=jax.ShapeDtypeStruct((N, H, W * G), jnp.float32),
        grid=(grid_n,),
        in_specs=[
            pl.BlockSpec((b_blk, H, W * C), lambda n: (n, 0, 0)),
            pl.BlockSpec((2, W * C), lambda n: (0, 0)),
            # Constant across the grid; for very large W*C*G add
            # pipeline_mode=pl.Buffered(1) here to single-buffer it on v7x.
            pl.BlockSpec((k_pad, W * G), lambda n: (0, 0)),
        ],
        out_specs=pl.BlockSpec((b_blk, H, W * G), lambda n: (n, 0, 0)),
        compiler_params=pltpu.CompilerParams(
            dimension_semantics=("parallel",)),
    )(x_rows, bn, m_fused)

    conv_nhwc = conv_rows.reshape(N, H, W, G)
    # torch.cat((x, out), dim=1): original channels first, then growth channels.
    out_nhwc = jnp.concatenate([x_nhwc, conv_nhwc], axis=-1)
    return jnp.transpose(out_nhwc, (0, 3, 1, 2))           # back to NCHW


def _reference_forward(x_nchw, gamma, beta, w_oihw):
    """Pure-JAX reference (training-mode BN + conv3x3 + concat), for verification."""
    x = x_nchw.astype(jnp.float32)
    mean = jnp.mean(x, axis=(0, 2, 3), keepdims=True)
    var = jnp.mean((x - mean) ** 2, axis=(0, 2, 3), keepdims=True)
    xn = (x - mean) * lax.rsqrt(var + 1e-5)
    a = jnp.maximum(xn * gamma.reshape(1, -1, 1, 1) + beta.reshape(1, -1, 1, 1), 0.0)
    conv = lax.conv_general_dilated(
        a, w_oihw.astype(jnp.float32), window_strides=(1, 1), padding=((1, 1), (1, 1)),
        dimension_numbers=("NCHW", "OIHW", "NCHW"))
    return jnp.concatenate([x, conv], axis=1)


if __name__ == "__main__":
    nChannels, growthRate = 4, 8
    N, H, W = 2, 16, 16

    key = jax.random.PRNGKey(0)
    kx, kw, kg, kb = jax.random.split(key, 4)
    x = jax.random.normal(kx, (N, nChannels, H, W), dtype=jnp.float32)
    # Deterministic synthetic params: conv ~ kaiming-ish normal, BN affine near identity.
    w = jax.random.normal(kw, (growthRate, nChannels, 3, 3), dtype=jnp.float32) * (
        2.0 / (9.0 * growthRate)) ** 0.5
    gamma = 1.0 + 0.1 * jax.random.normal(kg, (nChannels,), dtype=jnp.float32)
    beta = 0.1 * jax.random.normal(kb, (nChannels,), dtype=jnp.float32)

    out = single_layer_forward(x, gamma, beta, w)
    out = jax.block_until_ready(out)

    ref = jax.block_until_ready(_reference_forward(x, gamma, beta, w))
    assert out.shape == (N, nChannels + growthRate, H, W), out.shape
    # bf16 MXU operands -> loosened tolerance vs the f32 reference.
    assert jnp.allclose(out, ref, atol=5e-2, rtol=5e-2), float(jnp.max(jnp.abs(out - ref)))

    print("KERNEL_OK")
</pallas_src>

<mosaic_0001>
module attributes {stable_mosaic.version = 11 : i64} {
  func.func @single_layer_kernel(%arg0: i32, %arg1: memref<1x16x64xf32, #tpu.memory_space<vmem>>, %arg2: memref<2x64xf32, #tpu.memory_space<vmem>>, %arg3: memref<256x128xbf16, #tpu.memory_space<vmem>>, %arg4: memref<1x16x128xf32, #tpu.memory_space<vmem>>) attributes {dimension_semantics = [#tpu.dimension_semantics<parallel>], iteration_bounds = array<i64: 2>, scalar_prefetch = 0 : i64, scratch_operands = 0 : i64, tpu.core_type = #tpu.core_type<tc>, window_params = [{transform_indices = @transform_0, window_bounds = array<i64: 1, 16, 64>}, {pipeline_mode = #tpu.pipeline_mode<synchronous>, transform_indices = @transform_1, window_bounds = array<i64: 2, 64>}, {pipeline_mode = #tpu.pipeline_mode<synchronous>, transform_indices = @transform_2, window_bounds = array<i64: 256, 128>}, {transform_indices = @transform_3, window_bounds = array<i64: 1, 16, 128>}]} {
    %c0 = arith.constant 0 : index
    %c0_0 = arith.constant 0 : index
    %0 = vector.load %arg2[%c0, %c0_0] : memref<2x64xf32, #tpu.memory_space<vmem>>, vector<2x64xf32>
    %1 = vector.extract_strided_slice %0 {offsets = [0, 0], sizes = [1, 64], strides = [1, 1]} : vector<2x64xf32> to vector<1x64xf32>
    %2 = vector.extract_strided_slice %0 {offsets = [1, 0], sizes = [1, 64], strides = [1, 1]} : vector<2x64xf32> to vector<1x64xf32>
    %c0_1 = arith.constant 0 : index
    %c0_2 = arith.constant 0 : index
    %c0_3 = arith.constant 0 : index
    %3 = vector.load %arg1[%c0_1, %c0_2, %c0_3] : memref<1x16x64xf32, #tpu.memory_space<vmem>>, vector<1x16x64xf32>
    %4 = vector.shape_cast %3 : vector<1x16x64xf32> to vector<16x64xf32>
    %5 = vector.broadcast %1 : vector<1x64xf32> to vector<16x64xf32>
    %6 = arith.mulf %4, %5 : vector<16x64xf32>
    %7 = vector.broadcast %2 : vector<1x64xf32> to vector<16x64xf32>
    %8 = arith.addf %6, %7 : vector<16x64xf32>
    %cst = arith.constant 0.000000e+00 : f32
    %9 = vector.broadcast %cst : f32 to vector<16x64xf32>
    %10 = arith.maximumf %8, %9 : vector<16x64xf32>
    %11 = tpu.iota {dimensions = array<i32: 0>} : vector<16x1xi32>
    %c16_i32 = arith.constant 16 : i32
    %c0_i32 = arith.constant 0 : i32
    %12 = arith.cmpi eq, %c16_i32, %c0_i32 : i32
    %c1_i32 = arith.constant 1 : i32
    %13 = arith.select %12, %c1_i32, %c16_i32 : i32
    %14 = vector.broadcast %13 : i32 to vector<16x1xi32>
    %15 = arith.remsi %11, %14 : vector<16x1xi32>
    %c0_i32_4 = arith.constant 0 : i32
    %16 = vector.broadcast %c0_i32_4 : i32 to vector<16x1xi32>
    %17 = arith.cmpi ne, %15, %16 : vector<16x1xi32>
    %c0_i32_5 = arith.constant 0 : i32
    %18 = vector.broadcast %c0_i32_5 : i32 to vector<16x1xi32>
    %19 = arith.cmpi slt, %15, %18 : vector<16x1xi32>
    %c0_i32_6 = arith.constant 0 : i32
    %20 = arith.cmpi slt, %13, %c0_i32_6 : i32
    %21 = vector.broadcast %20 : i1 to vector<16x1xi1>
    %22 = vector.broadcast %21 : vector<16x1xi1> to vector<16x1xi1>
    %23 = arith.xori %19, %22 : vector<16x1xi1>
    %24 = arith.andi %23, %17 : vector<16x1xi1>
    %25 = vector.broadcast %13 : i32 to vector<16x1xi32>
    %26 = arith.addi %15, %25 : vector<16x1xi32>
    %27 = arith.select %24, %26, %15 : vector<16x1xi1>, vector<16x1xi32>
    %c0_i32_7 = arith.constant 0 : i32
    %28 = vector.broadcast %c0_i32_7 : i32 to vector<16x1xi32>
    %29 = arith.cmpi eq, %27, %28 : vector<16x1xi32>
    %c1_i32_8 = arith.constant 1 : i32
    %30 = tpu.dynamic_rotate %10 by %c1_i32_8 dim 0 : vector<16x64xf32>, i32 -> vector<16x64xf32>
    %cst_9 = arith.constant 0.000000e+00 : f32
    %31 = vector.shape_cast %29 : vector<16x1xi1> to vector<16x1xi1>
    %32 = vector.broadcast %31 : vector<16x1xi1> to vector<16x64xi1>
    %33 = vector.broadcast %cst_9 : f32 to vector<16x64xf32>
    %34 = arith.select %32, %33, %30 : vector<16x64xi1>, vector<16x64xf32>
    %c15_i32 = arith.constant 15 : i32
    %35 = vector.broadcast %c15_i32 : i32 to vector<16x1xi32>
    %36 = arith.cmpi eq, %27, %35 : vector<16x1xi32>
    %c15_i32_10 = arith.constant 15 : i32
    %37 = tpu.dynamic_rotate %10 by %c15_i32_10 dim 0 : vector<16x64xf32>, i32 -> vector<16x64xf32>
    %cst_11 = arith.constant 0.000000e+00 : f32
    %38 = vector.shape_cast %36 : vector<16x1xi1> to vector<16x1xi1>
    %39 = vector.broadcast %38 : vector<16x1xi1> to vector<16x64xi1>
    %40 = vector.broadcast %cst_11 : f32 to vector<16x64xf32>
    %41 = arith.select %39, %40, %37 : vector<16x64xi1>, vector<16x64xf32>
    %cst_12 = arith.constant 0.000000e+00 : f32
    %42 = vector.broadcast %cst_12 : f32 to vector<16x64xf32>
    %43 = tpu.concatenate %34, %10, %41, %42 in 1 : vector<16x64xf32>, vector<16x64xf32>, vector<16x64xf32>, vector<16x64xf32> -> vector<16x256xf32>
    %44 = arith.truncf %43 : vector<16x256xf32> to vector<16x256xbf16>
    %c0_13 = arith.constant 0 : index
    %c0_14 = arith.constant 0 : index
    %45 = vector.load %arg3[%c0_13, %c0_14] : memref<256x128xbf16, #tpu.memory_space<vmem>>, vector<256x128xbf16>
    %cst_15 = arith.constant dense<0.000000e+00> : vector<16x128xf32>
    %46 = tpu.matmul %44, %45, %cst_15 {dimension_numbers = #tpu.dot_dimension_numbers<[1], [0], [0], [1], [0, 0, 1, 1], [], []>} : vector<16x256xbf16>, vector<256x128xbf16>, vector<16x128xf32> -> vector<16x128xf32>
    %47 = vector.shape_cast %46 : vector<16x128xf32> to vector<1x16x128xf32>
    %c0_16 = arith.constant 0 : index
    %c0_17 = arith.constant 0 : index
    %c0_18 = arith.constant 0 : index
    %48 = vector.load %arg4[%c0_16, %c0_17, %c0_18] : memref<1x16x128xf32, #tpu.memory_space<vmem>>, vector<1x16x128xf32>
    tpu.vector_store %arg4[%c0_16, %c0_17, %c0_18], %47 {strides = array<i32>} : memref<1x16x128xf32, #tpu.memory_space<vmem>>, vector<1x16x128xf32>,
    return
  }
  func.func @transform_0(%arg0: i32) -> (i32, i32, i32) {
    %c0_i32 = arith.constant 0 : i32
    %c0_i32_0 = arith.constant 0 : i32
    %c0_i32_1 = arith.constant 0 : i32
    return %arg0, %c0_i32, %c0_i32_0 : i32, i32, i32
  }
  func.func @transform_1(%arg0: i32) -> (i32, i32) {
    %c0_i32 = arith.constant 0 : i32
    %c0_i32_0 = arith.constant 0 : i32
    %c0_i32_1 = arith.constant 0 : i32
    return %c0_i32, %c0_i32_0 : i32, i32
  }
  func.func @transform_2(%arg0: i32) -> (i32, i32) {
    %c0_i32 = arith.constant 0 : i32
    %c0_i32_0 = arith.constant 0 : i32
    %c0_i32_1 = arith.constant 0 : i32
    return %c0_i32, %c0_i32_0 : i32, i32
  }
  func.func @transform_3(%arg0: i32) -> (i32, i32, i32) {
    %c0_i32 = arith.constant 0 : i32
    %c0_i32_0 = arith.constant 0 : i32
    %c0_i32_1 = arith.constant 0 : i32
    return %arg0, %c0_i32, %c0_i32_0 : i32, i32, i32
  }
}

</mosaic_0001>

<bundles_post_ra>
// kernel: tpu_custom_call.1
= control target key start
LH: loop header
LB: loop body
LE: loop exit
PB: predicated region body
PF: predicated region fallthrough
CT: control target
= control target key end

     0   :  { %8 = vsyncpa [#allocation3], 0  ;;  %s1088_s0 = inlined_call_operand.hbm [shape: f32[2,16,64], index: 0, kind: input, shape index: {}]   ;;  %s1089_s1 = inlined_call_operand.vmem [shape: f32[2,64], index: 1, kind: input, shape index: {}]   ;;  %s1090_s2 = inlined_call_operand.hbm [shape: bf16[256,128], index: 2, kind: input, shape index: {}]   ;;  %s1091_s3 = inlined_call_operand.hbm [shape: f32[2,16,128], index: 3, kind: output, shape index: {}]  }
   0x1   :  { %10 = vsyncpa [#allocation3 + $0x1], 0 }
   0x2   :  { %11 = vsyncpa [#allocation6], 0 }
   0x3   :  { %12 = vsyncpa [#allocation4], 0 }
   0x4   :  { %14 = vsyncpa [#allocation4 + $0x1], 0  ;;  %s862_s12 = smov 0   ;;  %s864_s13 = smov 0  }
   0x5   :  { %s866_s14 = smov 0   ;;  %s868_s15 = smov 0  }
   0x6 LB: > { %s883_s16 = sadd.s32 4294967295, %s830_s15   ;;  %s558_s17 = sadd.s32 4294967294, %s830_s15   ;;  %s830_s15 = sphi %s868_s15, %s1115_s15   ;;  %s826_s14 = sphi %s866_s14, %s1114_s14   ;;  %s822_s13 = sphi %s864_s13, %s1113_s13   ;;  %s818_s12 = sphi %s862_s12, %s1112_s12  }
   0x7   : > { %p40_p0 = scmp.ne.s32.totalorder %s822_s13, %s818_s12  ;;  %p1092_p1 = scmp.eq.s32.totalorder %s883_s16, 0 }
   0x8   : > { %p112_p3 = scmp.eq.s32.totalorder %s558_s17, 1  ;;  %p559_p5 = scmp.ge.s32.totalorder %s830_s15, 1 }
   0x9   : > { %p892_p4 = por %p1092_p1, %p40_p0  ;;  %p119_p7 = scmp.lt.s32.totalorder %s830_s15, 3 }
   0xa   : > { %p897_p6 = por %p112_p3, %p40_p0  ;;  %s832_s21 = smov [#allocation5]  }
   0xb   : > { %s1095_s18 = scalar_select %p892_p4, 1, 0 }
   0xc   : > { %s1096_s19 = scalar_select %p897_p6, 1, 0 }
   0xd   : > { %p902_p8 = pnand %p559_p5, %p119_p7  ;;  %s134_s22 = sshll.u32 %s832_s21, 4  ;;  %s906_s22 = int_to_ptr.vmem [resolvable:$true] %s134_s22 }
   0xe   : > { %s918_s24 = sadd.s32 1, %s830_s15   ;;  %s27_s25 = sadd.s32 1, %s826_s14 }
   0xf   : > { %s1097_s20 = scalar_select %p902_p8, 1, 0 }
  0x10   : > { %p625_p9 = pneg %p902_p8  ;;  %s24_s26 = ssub.s32 %s830_s15, %s918_s24 }
  0x11   : > { %s702_s29 = scalar_lea.hbm %s1090_s2, 2048 }
  0x12   : > { %p913_p11 = pnand %p625_p9, %p1092_p1  ;;  %p703_p12 = scmp.ne.s32.totalorder %s1090_s2, %s702_s29 }
  0x13   : > { %p709_p5 = scmp.lt.u32.totalorder %s702_s29, %s1090_s2 }
  0x14   : > { %p704_p13 = pneg %p913_p11 }
  0x16   : > { %p705_p0 = pnand %p704_p13, %p703_p12 }
  0x18   : > { %p706_p3 = pneg %p705_p0 }
  0x1a   : > { %p711_p7 = pnand %p709_p5, %p706_p3 }
  0x1c   : > { %714 = shalt.err (!%p711_p7)
}
  0x1d   : > { %s715_s7 = scalar_lea.vmem %s906_s22, 2048  ;;  %p723_p2 = scmp.lt.s32.totalorder %s906_s22, %s906_s22 }
  0x1e   : > { %p716_p9 = scmp.ne.s32.totalorder %s906_s22, %s715_s7  ;;  %p724_p6 = scmp.lt.s32.totalorder %s715_s7, %s715_s7 }
  0x20   : > { %p718_p10 = pnand %p716_p9, %p704_p13  ;;  %p725_p4 = por %p724_p6, %p723_p2 }
  0x22   : > { %p719_p1 = pneg %p718_p10 }
  0x24   : > { %p726_p8 = pnand %p725_p4, %p719_p1 }
  0x26   : > { %729 = shalt.err (!%p726_p8)
}
  0x27   : > { %s833_s8 = smov 64   ;;  %s834_s9 = smov 4  }
  0x28   : > { %628 = dma.hbm_to_vmem [thread:$0]  (!%p913_p11), %s1090_s2, 2048, %s906_s22, [#allocation6], %s833_s8, %s833_s8, %s834_s9  }
  0x29   : > { %p25_p2 = scmp.eq.s32.totalorder %s24_s26, 0  ;;  %p34_p1 = scmp.ne.s32.totalorder %s826_s14, %s822_s13 }
  0x2a   : > { %p35_p4 = scmp.eq.s32.totalorder %s830_s15, 0  ;;  %p638_p6 = scmp.lt.s32.totalorder %s830_s15, 2 }
  0x2b   : > { %s949_s17 = scalar_select %p25_p2, %s826_s14, %s27_s25  }
  0x2c   : > { %p36_p8 = por %p35_p4, %p34_p1  ;;  %p1099_p10 = scmp.eq.s32.totalorder %s883_s16, 1 }
  0x2d   : > { %s148_s27 = sand.u32 1, %s826_s14   ;;  %s593_s28 = sshll.u32 %s830_s15, 8 }
  0x2e   : > { %p953_p12 = por %p1099_p10, %p34_p1  ;;  %s562_s29 = sshll.u32 %s148_s27, 4 }
  0x2f   : > { %s962_s4 = scalar_lea.hbm %s1088_s0, %s593_s28  ;;  %s152_s22 = scalar_lea.vmem [#allocation2], %s562_s29 }
  0x30   : > { %s159_s25 = sshll.u32 %s152_s22, 4  ;;  %p964_p11 = pnand %p638_p6, %p36_p8  ;;  %s968_s25 = int_to_ptr.vmem [resolvable:$true] %s159_s25 }
  0x31   : > { %s970_s5 = scalar_lea.sflag [#allocation3], %s148_s27  ;;  %s730_s6 = scalar_lea.hbm %s962_s4, 256 }
  0x32   : > { %p731_p13 = scmp.ne.s32.totalorder %s962_s4, %s730_s6  ;;  %p732_p0 = pneg %p964_p11 }
  0x33   : > { %s735_s9 = scalar_lea.hbm %s1088_s0, 512  ;;  %p736_p7 = scmp.lt.u32.totalorder %s962_s4, %s1088_s0 }
  0x34   : > { %p733_p3 = pnand %p732_p0, %p731_p13  ;;  %p737_p9 = scmp.lt.u32.totalorder %s735_s9, %s730_s6 }
  0x35   : > { %p739_p1 = scmp.lt.u32.totalorder %s730_s6, %s962_s4 }
  0x36   : > { %p734_p5 = pneg %p733_p3  ;;  %p738_p2 = por %p737_p9, %p736_p7 }
  0x38   : > { %p740_p4 = por %p739_p1, %p738_p2 }
  0x3a   : > { %p741_p6 = pnand %p740_p4, %p734_p5 }
  0x3c   : > { %744 = shalt.err (!%p741_p6)
}
  0x3d   : > { %s745_s27 = scalar_lea.vmem %s968_s25, 256  ;;  %s835_s28 = smov [#allocation2]  }
  0x3e   : > { %p746_p8 = scmp.ne.s32.totalorder %s968_s25, %s745_s27  ;;  %s750_s29 = sshll.u32 %s835_s28, 4  ;;  %s751_s29 = int_to_ptr.vmem [resolvable:$false] %s750_s29 }
  0x3f   : > { %s752_s23 = scalar_lea.vmem %s751_s29, 512  ;;  %p753_p3 = scmp.lt.s32.totalorder %s968_s25, %s751_s29 }
  0x40   : > { %p748_p10 = pnand %p746_p8, %p732_p0  ;;  %p754_p7 = scmp.lt.s32.totalorder %s752_s23, %s745_s27 }
  0x42   : > { %p749_p13 = pneg %p748_p10  ;;  %p755_p9 = por %p754_p7, %p753_p3 }
  0x44   : > { %p756_p2 = pnand %p755_p9, %p749_p13 }
  0x46   : > { %759 = shalt.err (!%p756_p2)
}
  0x47   : > { %s836_s30 = smov 128   ;;  %s837_s22 = smov 8  }
  0x48   : > { %632 = dma.hbm_to_vmem [thread:$0]  (!%p964_p11), %s962_s4, 256, %s968_s25, %s970_s5, %s836_s30, %s836_s30, %s837_s22  }
  0x49   : > { %p1102_p0 = scmp.ne.s32.totalorder %s1097_s20, 0 }
  0x4a   : > { %s1001_s6 = sand.u32 (!%p1102_p0), 1, %s822_s13   ;;  %p1103_p5 = scmp.ne.s32.totalorder (!%p1102_p0), %s1095_s18, 0 }
  0x4b   : > { %171 = sbr.rel (%p1102_p0) target bundleno = 454 (0x1c6), region = 32  ;;  %s566_s7 = sshll.u32 (!%p1102_p0), %s1001_s6, 4 }
  0x4c   : > { %s174_s8 = scalar_lea.sflag (!%p1102_p0), [#allocation3], %s1001_s6  ;;  %s177_s9 = scalar_lea.vmem (!%p1102_p0), [#allocation2], %s566_s7 }
  0x52   : > { %805 = dma.done.wait (%p1103_p5), %s174_s8, 256  }
  0x53   : > { %807 = vsyncadd (%p1103_p5), %s174_s8, 4294967040  ;;  %p1104_p11 = scmp.eq.s32.totalorder %s883_s16, 0 }
  0x55   : > { %809 = dma.done.wait (%p1104_p11), [#allocation6], 2048   ;;  %p1105_p1 = pmov %p1104_p11 }
  0x56   : > { %v208_v0 = vlaneseq  ;;  %v205_v4 = vld [vmem:[%s1089_s1] sm:$0x3]  ;;  %v207_v6 = vld [vmem:[%s177_s9 + $0x8] sm:$0xff]  ;;  %v690_v18 = vld [vmem:[#allocation5 + $0x50] sm:$0xff]   ;;  %vm283_vm1 = vcmask 523264   ;;  %s838_s18 = smov 64  }
  0x57   : > { %811 = vsyncadd (%p1105_p1), [#allocation6], 4294965248  ;;  %v206_v5 = vld [vmem:[%s177_s9] sm:$0xff]  ;;  %v688_v14 = vld [vmem:[#allocation5 + $0x48] sm:$0xff]   ;;  %s203_s25 = scalar_lea.vmem [#allocation7], %s566_s7  ;;  %s594_s5 = sshll.u32 %s883_s16, 8 }
  0x58   : > { %v209_v1 = vshrl.u32 %v208_v0, 7  ;;  %v686_v9 = vld [vmem:[#allocation5 + $0x40] sm:$0xff]   ;;  %v689_v15 = vld [vmem:[#allocation5 + $0x8] sm:$0xff]   ;;  %v691_v23 = vld [vmem:[#allocation5 + $0x10] sm:$0xff]   ;;  %s475_s26 = sshll.u32 %s203_s25, 4  ;;  %s1044_s27 = scalar_lea.hbm %s1091_s3, %s594_s5  ;;  %s1039_s26 = int_to_ptr.vmem [resolvable:$true] %s475_s26 }
  0x59   : > { %v687_v10 = vld [vmem:[#allocation5] sm:$0xff]   ;;  %595 = vmatprep.subr.bf16.mxu0 %v686_v9  ;;  %v692_v27 = vld [vmem:[#allocation5 + $0x58] sm:$0xff]   ;;  %vm585_vm5 = vmpackc.low %vm283_vm1, %vm283_vm1  ;;  %s462_s28 = scalar_lea.sflag [#allocation4], %s1001_s6  ;;  %s760_s29 = scalar_lea.vmem %s1039_s26, 256 }
  0x5a   : > { %v210_v2 = vsub.s32 0, %v209_v1  ;;  %v216_v3 = vsub.s32 1, %v209_v1  ;;  %v224_v11 = vadd.s32 8, %v209_v1  ;;  %596 = vmatpush3.bf16.msra.mxu0 %v687_v10  ;;  %vm266_vm0 = vcmp.lt.s32.totalorder %v209_v1, 7  ;;  %v693_v33 = vld [vmem:[#allocation5 + $0x18] sm:$0xff]   ;;  %v694_v35 = vld [vmem:[#allocation5 + $0x60] sm:$0xff]   ;;  %p761_p4 = scmp.ne.s32.totalorder %s1039_s26, %s760_s29 }
  0x5b   : > { %597 = vmatprep.subr.bf16.mxu0 %v688_v14  ;;  %v229_v19 = vand.u32 15, %v209_v1  ;;  %vm253_vm2 = vcmp.lt.s32.totalorder %v209_v1, 1  ;;  %v695_v40 = vld [vmem:[#allocation5 + $0x20] sm:$0xff]   ;;  %v696_v42 = vld [vmem:[#allocation5 + $0x68] sm:$0xff]   ;;  %v698_v44 = vld [vmem:[#allocation5 + $0x70] sm:$0xff]   ;;  %s839_s16 = smov [#allocation7]  }
  0x5c   : > { %v211_v7 = vrot.slane %v205_v4, %v210_v2  ;;  %v217_v8 = vrot.slane %v205_v4, %v216_v3  ;;  %v236_v20 = vand.u32 15, %v224_v11  ;;  %v697_v43 = vld [vmem:[#allocation5 + $0x28] sm:$0xff]   ;;  %v699_v45 = vld [vmem:[#allocation5 + $0x30] sm:$0xff]   ;;  %v700_v46 = vld [vmem:[#allocation5 + $0x78] sm:$0xff]   ;;  %p762_p6 = pnand %p761_p4, %p953_p12  ;;  %s764_s23 = sshll.u32 %s839_s16, 4  ;;  %s765_s23 = int_to_ptr.vmem [resolvable:$false] %s764_s23 }
  0x5d   : > { %vm1018_vm3 = vcmp.eq.s32.totalorder %v229_v19, 0  ;;  %v701_v47 = vld [vmem:[#allocation5 + $0x38] sm:$0xff]   ;;  %s766_s30 = scalar_lea.vmem %s765_s23, 512  ;;  %p767_p10 = scmp.lt.s32.totalorder %s1039_s26, %s765_s23 }
  0x5e   : > { %v212_v12 = vmul.f32 %v211_v7, %v206_v5  ;;  %v213_v13 = vmul.f32 %v211_v7, %v207_v6  ;;  %598 = vmatpush3.bf16.msra.mxu0 %v689_v15  ;;  %vm1022_vm4 = vcmp.eq.s32.totalorder %v236_v20, 15  ;;  %p763_p8 = pneg %p762_p6  ;;  %p768_p13 = scmp.lt.s32.totalorder %s766_s30, %s760_s29 }
  0x5f   : > { %599 = vmatprep.subr.bf16.mxu0 %v690_v18 }
  0x60   : > { %v218_v16 = vadd.f32 %v217_v8, %v212_v12  ;;  %v219_v17 = vadd.f32 %v217_v8, %v213_v13  ;;  %p769_p3 = por %p768_p13, %p767_p10 }
  0x62   : > { %v220_v21 = vmax.f32 %v218_v16, 0.0  ;;  %v221_v22 = vmax.f32 %v219_v17, 0.0  ;;  %600 = vmatpush3.bf16.msra.mxu0 %v691_v23  ;;  %p770_p7 = pnand %p769_p3, %p763_p8 }
  0x63   : > { %601 = vmatprep.subr.bf16.mxu0 %v692_v27 }
  0x64   : > { %v252_v24 = vrot.slane %v221_v22, 7  ;;  %v681_v25 = vpack.i.bf16 %v221_v22, %v220_v21  ;;  %v251_v26 = vrot.slane %v220_v21, 7  ;;  %v264_v30 = vrot.slane %v220_v21, 1 }
  0x65   : > { %v265_v34 = vrot.slane %v221_v22, 1 }
  0x66   : > { %682 = vrot.lane.b32.xlu0 %v681_v25, %s838_s18  ;;  %v254_v31 = vsel %vm253_vm2, %v251_v26, %v252_v24  ;;  %v255_v32 = vsel %vm253_vm2, %v252_v24, %v251_v26  ;;  %602 = vmatpush3.bf16.msra.mxu0 %v693_v33 }
  0x67   : > { %v260_v36 = vsel %vm1018_vm3, 0.0, %v255_v32  ;;  %v267_v37 = vsel %vm266_vm0, %v264_v30, %v265_v34  ;;  %v268_v38 = vsel %vm266_vm0, %v265_v34, %v264_v30  ;;  %603 = vmatprep.subr.bf16.mxu0 %v694_v35 }
  0x68   : > { %v274_v39 = vsel %vm1022_vm4, 0.0, %v268_v38 }
  0x69   : > { %v586_v41 = vpack.c.bf16 %v274_v39, %v267_v37 }
  0x6a   : > { %604 = vmatpush3.bf16.msra.mxu0 %v695_v40 }
  0x6b   : > { %587 = vmatprep.mubr.msk.bf16.mxu0 %vm585_vm5, %v586_v41  ;;  %605 = vmatprep.subr.bf16.mxu0 %v696_v42 }
  0x6e   : > { %606 = vmatpush3.bf16.msra.mxu0 %v697_v43 }
  0x6f   : > { %607 = vmatprep.subr.bf16.mxu0 %v698_v44 }
  0x72   : > { %608 = vmatpush3.bf16.msra.mxu0 %v699_v45 }
  0x73   : > { %609 = vmatprep.subr.bf16.mxu0 %v700_v46 }
  0x76   : > { %610 = vmatpush3.bf16.msra.mxu0 %v701_v47 }
  0xd8   : > { %v683_v48 = vpop.permute.xlu0 %682 }
  0xd9   : > { %v685_v49 = vunpack.i.h.bf16 %v683_v48  ;;  %v684_v50 = vunpack.i.l.bf16 %v683_v48 }
  0xdb   : > { %v284_v51 = vsel %vm283_vm1, %v260_v36, %v684_v50  ;;  %v285_v52 = vsel %vm283_vm1, %v254_v31, %v685_v49 }
  0xdc   : > { %v288_v53 = vpack.c.bf16 %v285_v52, %v284_v51 }
  0xde   : > { %451 = vmatmul.mubr.bf16.vlgmr.msra.gmra.mrb[0].mxu0 %v288_v53 }
 0x1b1   : > { %v611_v54 = vpop.f32.mrb[0].mxu0 }
 0x1b2   : > { %v612_v55 = vpop.f32.mrb[1].mxu0 }
 0x1b3   : > { %v613_v56 = vadd.f32 %v612_v55, %v611_v54  ;;  %v614_v57 = vpop.f32.mrb[2].mxu0 }
 0x1b4   : > { %v615_v58 = vpop.f32.mrb[3].mxu0 }
 0x1b5   : > { %459 = vst [vmem:[%s203_s25] sm:$0xff] %v613_v56  ;;  %v616_v59 = vadd.f32 %v615_v58, %v614_v57 }
 0x1b7   : > { %460 = vst [vmem:[%s203_s25 + $0x8] sm:$0xff] %v616_v59 }
 0x1b8   : > { %773 = shalt.err (!%p770_p7)
}
 0x1b9   : > { %s774_s22 = scalar_lea.hbm %s1044_s27, 256  ;;  %s778_s9 = scalar_lea.hbm %s1091_s3, 512 }
 0x1ba   : > { %p775_p9 = scmp.ne.s32.totalorder %s1044_s27, %s774_s22  ;;  %p779_p5 = scmp.lt.u32.totalorder %s1044_s27, %s1091_s3 }
 0x1bb   : > { %p780_p11 = scmp.lt.u32.totalorder %s778_s9, %s774_s22  ;;  %p782_p4 = scmp.lt.u32.totalorder %s774_s22, %s1044_s27 }
 0x1bc   : > { %p776_p2 = pnand %p775_p9, %p953_p12 }
 0x1bd   : > { %p781_p1 = por %p780_p11, %p779_p5 }
 0x1be   : > { %p777_p0 = pneg %p776_p2 }
 0x1bf   : > { %p783_p6 = por %p782_p4, %p781_p1 }
 0x1c1   : > { %p784_p8 = pnand %p783_p6, %p777_p0 }
 0x1c3   : > { %787 = shalt.err (!%p784_p8)
}
 0x1c4   : > { %s840_s18 = smov 128   ;;  %s841_s25 = smov 8  }
 0x1c5   : > { %623 = dma.vmem_to_hbm [thread:$0]  (%p953_p12), %s1039_s26, 256, %s1044_s27, %s462_s28, %s840_s18, %s840_s18, %s841_s25  }
 0x1c6 PF: > { %s490_s5 = sand.u32 1, %s818_s12   ;;  %p1110_p10 = scmp.ne.s32.totalorder %s1096_s19, 0 }
 0x1c7   : > { %p1111_p13 = scmp.ge.s32.totalorder %s830_s15, 2  ;;  %s491_s10 = scalar_lea.sflag [#allocation4], %s490_s5 }
 0x1c9   : > { %p634_p3 = pnand %p1111_p13, %p1110_p10 }
 0x1cb   : > { %813 = dma.done.wait (!%p634_p3), %s491_s10, 256  }
 0x1cc   : > { %815 = vsyncadd (!%p634_p3), %s491_s10, 4294967040  ;;  %p17_p7 = scmp.ge.s32.totalorder %s918_s24, 4   ;;  %s1112_s12 = smov %s822_s13 }
 0x1cd   : > { %s1113_s13 = smov %s826_s14  ;;  %s1114_s14 = smov %s949_s17 }
 0x1ce   : > { %s1115_s15 = smov %s918_s24  ;;  %19 = sbr.rel (!%p17_p7) target bundleno = 6 (0x6), region = 81 }
 0x1d5   :  { %496 = vsyncpa [#allocation3], 1 }
 0x1d6   :  { %498 = vsyncpa [#allocation3 + $0x1], 1 }
 0x1d7   :  { %499 = vsyncpa [#allocation6], 1 }
 0x1d8   :  { %500 = vsyncpa [#allocation4], 1 }
 0x1d9   :  { %502 = vsyncpa [#allocation4 + $0x1], 1 }

</bundles_post_ra>
